<compile_context>
chip_gen: v5e
topology: v5e:2x2
jax: 0.10.0
libtpu: 0.0.40
codegen_flags: <defaults>
</compile_context>

<pallas_src>
import jax
import jax.numpy as jnp
from jax.experimental import pallas as pl
from jax.experimental.pallas import tpu as pltpu

H1 = 128       # padded width of fc1 / fa1 outputs (orig 125)
H2 = 256       # padded width of fca1 output (orig 250); also fused input width
TB_MAX = 2048  # max batch tile (per-tile VMEM footprint < 6 MiB at 2048)


def _round_up(x, m):
    return ((x + m - 1) // m) * m


# ---------------------------------------------------------------------------
# Kernel: full Critic forward for one batch tile.
# ---------------------------------------------------------------------------
def critic_kernel(
    sa_ref,     # (TB, K_pad)   bf16  state||action, zero padded
    w_in_ref,   # (K_pad, 256)  bf16  block-diag: w1 -> lanes 0..124, wa -> 128..252
    b_in_ref,   # (1, 256)      f32   [b1 | 0 | ba | 0]
    wc1_ref,    # (256, 256)    bf16  fca1 weight in padded-concat row layout
    bc1_ref,    # (1, 256)      f32
    wc2_ref,    # (1, 256)      f32   fca2 weight as a lane row (zero padded)
    bc2_ref,    # (1, 1)        f32   in SMEM
    out_ref,    # (TB, 1)       f32
):
    # Fused fc1/fa1: one small-K MXU pass; output lanes are already the
    # torch.cat((xs, xa), dim=1) layout (pad lanes 125..127 / 253..255 are 0).
    x = jnp.dot(sa_ref[...], w_in_ref[...], preferred_element_type=jnp.float32)
    x = jnp.maximum(x + b_in_ref[...], 0.0)                       # (TB, 256) f32

    # fca1: single 256x256 MXU tile (bf16 operands, f32 accumulation).
    h = jnp.dot(x.astype(jnp.bfloat16), wc1_ref[...],
                preferred_element_type=jnp.float32)
    h = jnp.maximum(h + bc1_ref[...], 0.0)                        # (TB, 256) f32

    # fca2 (256 -> 1): VPU multiply + XLU lane reduce (padded lanes are zero).
    q = jnp.sum(h * wc2_ref[...], axis=-1, keepdims=True) + bc2_ref[0, 0]
    out_ref[...] = q


# ---------------------------------------------------------------------------
# Wrapper: batch-tiled pallas_call with VMEM-resident weights.
# ---------------------------------------------------------------------------
def critic_forward(state, action, params):
    B = state.shape[0]
    K = state.shape[1] + action.shape[1]
    K_pad = params["w_in"].shape[0]
    assert K_pad >= K

    # Tile selection:
    #   * at most TB_MAX rows per tile,
    #   * at least 2 tiles once B >= 64 so both v7x TensorCores run,
    #   * tile rows a multiple of 16 (bf16 sublane packing).
    n_tiles = max(1, -(-B // TB_MAX))
    if B >= 64:
        n_tiles = max(n_tiles, 2)
    TB = max(16, _round_up(-(-B // n_tiles), 16))
    B_pad = n_tiles * TB

    sa = jnp.concatenate([state, action], axis=1)
    sa = jnp.pad(sa, ((0, B_pad - B), (0, K_pad - K)))
    sa = sa.astype(jnp.bfloat16)

    # Weight/bias specs: full-array blocks with a constant index_map, so they
    # are DMA'd once and stay VMEM-resident across all batch tiles.
    def resident(shape):
        return pl.BlockSpec(shape, lambda i: (0, 0))

    in_specs = [
        pl.BlockSpec((TB, K_pad), lambda i: (i, 0)),   # sa (streamed per tile)
        resident((K_pad, H2)),                         # w_in
        resident((1, H2)),                             # b_in
        resident((H2, H2)),                            # wc1
        resident((1, H2)),                             # bc1
        resident((1, H2)),                             # wc2 (lane row)
        pl.BlockSpec(memory_space=pltpu.SMEM),         # bc2 scalar
    ]
    out_specs = pl.BlockSpec((TB, 1), lambda i: (i, 0))
    # NOTE: (B,1) output keeps masked stores; write traffic is negligible next
    # to the 256-wide matmul per row, so lane-dense repacking is not worth it.

    flops = 2 * B_pad * (K_pad * H2 + H2 * H2 + H2)
    bytes_accessed = (
        2 * B_pad * K_pad + 4 * B_pad            # streamed bf16 input / f32 out
        + 2 * (K_pad * H2 + H2 * H2)             # bf16 weights
        + 4 * (3 * H2 + 1)                       # f32 biases + wc2 + bc2
    )

    out = pl.pallas_call(
        critic_kernel,
        out_shape=jax.ShapeDtypeStruct((B_pad, 1), jnp.float32),
        grid_spec=pltpu.PrefetchScalarGridSpec(
            num_scalar_prefetch=0,
            grid=(n_tiles,),
            in_specs=in_specs,
            out_specs=out_specs,
        ),
        compiler_params=pltpu.CompilerParams(
            dimension_semantics=("parallel",),
        ),
        cost_estimate=pl.CostEstimate(
            flops=flops, transcendentals=0, bytes_accessed=bytes_accessed
        ),
    )(
        sa,
        params["w_in"], params["b_in"],
        params["wc1"], params["bc1"],
        params["wc2"], params["bc2"],
    )
    return out[:B]


# ---------------------------------------------------------------------------
# Parameter init (mirrors nn.init.xavier_uniform_ + bias=0.01) and repacking.
# ---------------------------------------------------------------------------
def xavier_uniform(key, fan_in, fan_out):
    bound = jnp.sqrt(6.0 / (fan_in + fan_out))
    # Stored as (in, out) so the kernel does x @ W directly.
    return jax.random.uniform(
        key, (fan_in, fan_out), dtype=jnp.float32, minval=-bound, maxval=bound
    )


def init_critic_params(key, state_dim, action_dim):
    """Raw (unpadded, f32) parameters at the original 125/250 sizes."""
    k1, k2, k3, k4 = jax.random.split(key, 4)
    bias = lambda n: jnp.full((1, n), 0.01, dtype=jnp.float32)
    return {
        "w1": xavier_uniform(k1, state_dim, 125), "b1": bias(125),
        "wa": xavier_uniform(k2, action_dim, 125), "ba": bias(125),
        "wc1": xavier_uniform(k3, 250, 250), "bc1": bias(250),
        "wc2": xavier_uniform(k4, 250, 1), "bc2": bias(1),
    }


def pad_params(raw, state_dim, action_dim):
    """Repack/zero-pad to MXU-friendly fused shapes (math unchanged by pads)."""
    K = state_dim + action_dim
    K_pad = _round_up(K, 8)

    # Fused fc1/fa1 weight: block-diagonal so sa @ w_in lands xs in lanes
    # 0..124 and xa in lanes 128..252 (pad lanes are exactly zero).
    w_in = jnp.zeros((K_pad, H2), jnp.float32)
    w_in = w_in.at[0:state_dim, 0:125].set(raw["w1"])
    w_in = w_in.at[state_dim:K, H1:H1 + 125].set(raw["wa"])
    b_in = jnp.zeros((1, H2), jnp.float32)
    b_in = b_in.at[:, 0:125].set(raw["b1"])
    b_in = b_in.at[:, H1:H1 + 125].set(raw["ba"])

    # fca1 weight rearranged for the padded-concat row layout:
    # rows 0..124 multiply xs lanes, rows 128..252 multiply xa lanes.
    wc1 = jnp.zeros((H2, H2), jnp.float32)
    wc1 = wc1.at[0:125, 0:250].set(raw["wc1"][0:125, :])
    wc1 = wc1.at[H1:H1 + 125, 0:250].set(raw["wc1"][125:250, :])
    bc1 = jnp.zeros((1, H2), jnp.float32).at[:, 0:250].set(raw["bc1"])

    # fca2 weight as a (1, 256) lane row for the VPU multiply + XLU reduce.
    wc2 = jnp.zeros((1, H2), jnp.float32).at[0, 0:250].set(raw["wc2"][:, 0])

    return {
        "w_in": w_in.astype(jnp.bfloat16),   # bf16 MXU operand
        "b_in": b_in,                        # f32
        "wc1": wc1.astype(jnp.bfloat16),     # bf16 MXU operand
        "bc1": bc1,                          # f32
        "wc2": wc2,                          # f32 (VPU/XLU head)
        "bc2": raw["bc2"],                   # (1, 1) f32, lives in SMEM
    }


# ---------------------------------------------------------------------------
# Pure-JAX references.
# ---------------------------------------------------------------------------
def critic_reference_f32(state, action, p):
    """Original module math in f32 (unpadded weights)."""
    xs = jax.nn.relu(state @ p["w1"] + p["b1"])
    xa = jax.nn.relu(action @ p["wa"] + p["ba"])
    x = jnp.concatenate([xs, xa], axis=1)
    h = jax.nn.relu(x @ p["wc1"] + p["bc1"])
    return h @ p["wc2"] + p["bc2"]


def critic_reference_bf16(state, action, p):
    """Mirrors the kernel math exactly (padded bf16 operands, f32 accumulate)."""
    K = state.shape[1] + action.shape[1]
    K_pad = p["w_in"].shape[0]
    sa = jnp.concatenate([state, action], axis=1)
    sa = jnp.pad(sa, ((0, 0), (0, K_pad - K))).astype(jnp.bfloat16)
    x = jnp.maximum(
        jnp.dot(sa, p["w_in"], preferred_element_type=jnp.float32) + p["b_in"], 0.0)
    h = jnp.maximum(
        jnp.dot(x.astype(jnp.bfloat16), p["wc1"],
                preferred_element_type=jnp.float32) + p["bc1"], 0.0)
    return jnp.sum(h * p["wc2"], axis=-1, keepdims=True) + p["bc2"][0, 0]


if __name__ == "__main__":
    state_dim, action_dim = 8, 4

    key = jax.random.PRNGKey(0)
    kp, kd = jax.random.split(key)
    raw_params = init_critic_params(kp, state_dim, action_dim)
    kernel_params = pad_params(raw_params, state_dim, action_dim)

    # B=2: tiny single tile; B=37: row padding to a non-trivial tile;
    # B=300: multi-tile grid (2 parallel tiles) + row padding.
    for B in (2, 37, 300):
        ks, ka = jax.random.split(jax.random.fold_in(kd, B))
        state = jax.random.normal(ks, (B, state_dim), dtype=jnp.float32)
        action = jax.random.normal(ka, (B, action_dim), dtype=jnp.float32)

        out = critic_forward(state, action, kernel_params)
        jax.block_until_ready(out)
        assert out.shape == (B, 1)

        # Exact structural check: pure-JAX mirror of the kernel's bf16 math.
        ref_b = critic_reference_bf16(state, action, kernel_params)
        assert jnp.allclose(out, ref_b, atol=1e-4, rtol=1e-4), ("bf16 ref", B)

        # Loose check vs. the original f32 module math (bf16 matmul operands
        # are a deliberate precision tradeoff per the perf review).
        ref_f = critic_reference_f32(state, action, raw_params)
        assert jnp.allclose(out, ref_f, atol=5e-2, rtol=5e-2), ("f32 ref", B)

    print("KERNEL_OK")
</pallas_src>

<mosaic_0001>
module attributes {stable_mosaic.version = 11 : i64} {
  func.func @critic_kernel(%arg0: i32, %arg1: memref<16x16xbf16, #tpu.memory_space<vmem>>, %arg2: memref<16x256xbf16, #tpu.memory_space<vmem>>, %arg3: memref<1x256xf32, #tpu.memory_space<vmem>>, %arg4: memref<256x256xbf16, #tpu.memory_space<vmem>>, %arg5: memref<1x256xf32, #tpu.memory_space<vmem>>, %arg6: memref<1x256xf32, #tpu.memory_space<vmem>>, %arg7: memref<1x1xf32, #tpu.memory_space<smem>>, %arg8: memref<16x1xf32, #tpu.memory_space<vmem>>) attributes {dimension_semantics = [#tpu.dimension_semantics<parallel>], iteration_bounds = array<i64: 1>, scalar_prefetch = 0 : i64, scratch_operands = 0 : i64, tpu.core_type = #tpu.core_type<tc>, window_params = [{transform_indices = @transform_0, window_bounds = array<i64: 16, 16>}, {pipeline_mode = #tpu.pipeline_mode<synchronous>, transform_indices = @transform_1, window_bounds = array<i64: 16, 256>}, {pipeline_mode = #tpu.pipeline_mode<synchronous>, transform_indices = @transform_2, window_bounds = array<i64: 1, 256>}, {pipeline_mode = #tpu.pipeline_mode<synchronous>, transform_indices = @transform_3, window_bounds = array<i64: 256, 256>}, {pipeline_mode = #tpu.pipeline_mode<synchronous>, transform_indices = @transform_4, window_bounds = array<i64: 1, 256>}, {pipeline_mode = #tpu.pipeline_mode<synchronous>, transform_indices = @transform_5, window_bounds = array<i64: 1, 256>}, {transform_indices = @transform_6, window_bounds = array<i64: 1, 1>}, {transform_indices = @transform_7, window_bounds = array<i64: 16, 1>}]} {
    %c0 = arith.constant 0 : index
    %c0_0 = arith.constant 0 : index
    %0 = vector.load %arg1[%c0, %c0_0] : memref<16x16xbf16, #tpu.memory_space<vmem>>, vector<16x16xbf16>
    %c0_1 = arith.constant 0 : index
    %c0_2 = arith.constant 0 : index
    %1 = vector.load %arg2[%c0_1, %c0_2] : memref<16x256xbf16, #tpu.memory_space<vmem>>, vector<16x256xbf16>
    %cst = arith.constant dense<0.000000e+00> : vector<16x256xf32>
    %2 = tpu.matmul %0, %1, %cst {dimension_numbers = #tpu.dot_dimension_numbers<[1], [0], [0], [1], [0, 0, 1, 1], [], []>} : vector<16x16xbf16>, vector<16x256xbf16>, vector<16x256xf32> -> vector<16x256xf32>
    %c0_3 = arith.constant 0 : index
    %c0_4 = arith.constant 0 : index
    %3 = vector.load %arg3[%c0_3, %c0_4] : memref<1x256xf32, #tpu.memory_space<vmem>>, vector<1x256xf32>
    %4 = vector.broadcast %3 : vector<1x256xf32> to vector<16x256xf32>
    %5 = arith.addf %2, %4 : vector<16x256xf32>
    %cst_5 = arith.constant 0.000000e+00 : f32
    %6 = vector.broadcast %cst_5 : f32 to vector<16x256xf32>
    %7 = arith.maximumf %5, %6 : vector<16x256xf32>
    %8 = arith.truncf %7 : vector<16x256xf32> to vector<16x256xbf16>
    %c0_6 = arith.constant 0 : index
    %c0_7 = arith.constant 0 : index
    %9 = vector.load %arg4[%c0_6, %c0_7] : memref<256x256xbf16, #tpu.memory_space<vmem>>, vector<256x256xbf16>
    %cst_8 = arith.constant dense<0.000000e+00> : vector<16x256xf32>
    %10 = tpu.matmul %8, %9, %cst_8 {dimension_numbers = #tpu.dot_dimension_numbers<[1], [0], [0], [1], [0, 0, 1, 1], [], []>} : vector<16x256xbf16>, vector<256x256xbf16>, vector<16x256xf32> -> vector<16x256xf32>
    %c0_9 = arith.constant 0 : index
    %c0_10 = arith.constant 0 : index
    %11 = vector.load %arg5[%c0_9, %c0_10] : memref<1x256xf32, #tpu.memory_space<vmem>>, vector<1x256xf32>
    %12 = vector.broadcast %11 : vector<1x256xf32> to vector<16x256xf32>
    %13 = arith.addf %10, %12 : vector<16x256xf32>
    %cst_11 = arith.constant 0.000000e+00 : f32
    %14 = vector.broadcast %cst_11 : f32 to vector<16x256xf32>
    %15 = arith.maximumf %13, %14 : vector<16x256xf32>
    %c0_12 = arith.constant 0 : index
    %c0_13 = arith.constant 0 : index
    %16 = vector.load %arg6[%c0_12, %c0_13] : memref<1x256xf32, #tpu.memory_space<vmem>>, vector<1x256xf32>
    %17 = vector.broadcast %16 : vector<1x256xf32> to vector<16x256xf32>
    %18 = arith.mulf %15, %17 : vector<16x256xf32>
    %cst_14 = arith.constant dense<0.000000e+00> : vector<16xf32>
    %19 = vector.multi_reduction <add>, %18, %cst_14 [1] : vector<16x256xf32> to vector<16xf32>
    %20 = vector.shape_cast %19 : vector<16xf32> to vector<16x1xf32>
    %c0_15 = arith.constant 0 : index
    %c0_16 = arith.constant 0 : index
    %21 = memref.load %arg7[%c0_15, %c0_16] : memref<1x1xf32, #tpu.memory_space<smem>>
    %22 = vector.broadcast %21 : f32 to vector<16x1xf32>
    %23 = arith.addf %20, %22 : vector<16x1xf32>
    %c0_17 = arith.constant 0 : index
    %c0_18 = arith.constant 0 : index
    %24 = vector.load %arg8[%c0_17, %c0_18] : memref<16x1xf32, #tpu.memory_space<vmem>>, vector<16x1xf32>
    tpu.vector_store %arg8[%c0_17, %c0_18], %23 {strides = array<i32>} : memref<16x1xf32, #tpu.memory_space<vmem>>, vector<16x1xf32>,
    return
  }
  func.func @transform_0(%arg0: i32) -> (i32, i32) {
    %c0_i32 = arith.constant 0 : i32
    %c0_i32_0 = arith.constant 0 : i32
    return %arg0, %c0_i32 : i32, i32
  }
  func.func @transform_1(%arg0: i32) -> (i32, i32) {
    %c0_i32 = arith.constant 0 : i32
    %c0_i32_0 = arith.constant 0 : i32
    %c0_i32_1 = arith.constant 0 : i32
    return %c0_i32, %c0_i32_0 : i32, i32
  }
  func.func @transform_2(%arg0: i32) -> (i32, i32) {
    %c0_i32 = arith.constant 0 : i32
    %c0_i32_0 = arith.constant 0 : i32
    %c0_i32_1 = arith.constant 0 : i32
    return %c0_i32, %c0_i32_0 : i32, i32
  }
  func.func @transform_3(%arg0: i32) -> (i32, i32) {
    %c0_i32 = arith.constant 0 : i32
    %c0_i32_0 = arith.constant 0 : i32
    %c0_i32_1 = arith.constant 0 : i32
    return %c0_i32, %c0_i32_0 : i32, i32
  }
  func.func @transform_4(%arg0: i32) -> (i32, i32) {
    %c0_i32 = arith.constant 0 : i32
    %c0_i32_0 = arith.constant 0 : i32
    %c0_i32_1 = arith.constant 0 : i32
    return %c0_i32, %c0_i32_0 : i32, i32
  }
  func.func @transform_5(%arg0: i32) -> (i32, i32) {
    %c0_i32 = arith.constant 0 : i32
    %c0_i32_0 = arith.constant 0 : i32
    %c0_i32_1 = arith.constant 0 : i32
    return %c0_i32, %c0_i32_0 : i32, i32
  }
  func.func @transform_6(%arg0: i32) -> (i32, i32) {
    %c0_i32 = arith.constant 0 : i32
    %c0_i32_0 = arith.constant 0 : i32
    %c0_i32_1 = arith.constant 0 : i32
    return %c0_i32, %c0_i32_0 : i32, i32
  }
  func.func @transform_7(%arg0: i32) -> (i32, i32) {
    %c0_i32 = arith.constant 0 : i32
    %c0_i32_0 = arith.constant 0 : i32
    return %arg0, %c0_i32 : i32, i32
  }
}

</mosaic_0001>

<bundles_post_ra>
// kernel: tpu_custom_call.1
= control target key start
LH: loop header
LB: loop body
LE: loop exit
PB: predicated region body
PF: predicated region fallthrough
CT: control target
= control target key end

     0   :  { %13 = vsyncpa [#allocation4], 0  ;;  %s761_s0 = inlined_call_operand.hbm [shape: bf16[16,16], index: 0, kind: input, shape index: {}]   ;;  %s762_s1 = inlined_call_operand.hbm [shape: bf16[16,256], index: 1, kind: input, shape index: {}]   ;;  %s763_s2 = inlined_call_operand.vmem [shape: f32[1,256], index: 2, kind: input, shape index: {}]   ;;  %s764_s3 = inlined_call_operand.hbm [shape: bf16[256,256], index: 3, kind: input, shape index: {}]   ;;  %s765_s4 = inlined_call_operand.vmem [shape: f32[1,256], index: 4, kind: input, shape index: {}]   ;;  %s766_s5 = inlined_call_operand.vmem [shape: f32[1,256], index: 5, kind: input, shape index: {}]   ;;  %s767_s6 = inlined_call_operand.<no memory space> [shape: f32[1,1], index: 6, kind: input, shape index: {}]   ;;  %s768_s7 = inlined_call_operand.vmem [shape: f32[16,1], index: 7, kind: output, shape index: {}]  }
   0x1   :  { %14 = vsyncpa [#allocation6], 0  ;;  %s32_s26 = sshll.u32 %s762_s1, 4  ;;  %s685_s27 = smov [#allocation5]   ;;  %s33_s26 = int_to_ptr.hbm [resolvable:$true] %s32_s26 }
   0x2   :  { %s34_s28 = sshll.u32 %s685_s27, 4  ;;  %s19_s8 = sshll.u32 %s761_s0, 4  ;;  %s35_s28 = int_to_ptr.vmem [resolvable:$true] %s34_s28  ;;  %s20_s8 = int_to_ptr.hbm [resolvable:$true] %s19_s8 }
   0x3   :  { %s686_s9 = smov 128   ;;  %s687_s10 = smov 8  }
   0x4   :  { %40 = dma.hbm_to_vmem [thread:$0]  %s33_s26, 256, %s35_s28, [#allocation6], %s686_s9, %s686_s9, %s687_s10  }
   0x5   :  { %s688_s11 = smov [#allocation3]   ;;  %s689_s13 = smov 64  }
   0x6   :  { %s21_s12 = sshll.u32 %s688_s11, 4  ;;  %s690_s14 = smov 4   ;;  %s22_s12 = int_to_ptr.vmem [resolvable:$true] %s21_s12 }
   0x7   :  { %27 = dma.hbm_to_vmem [thread:$0]  %s20_s8, 128, %s22_s12, [#allocation4], %s689_s13, %s689_s13, %s690_s14  }
   0x8   :  { %s47_s16 = sshll.u32 %s764_s3, 4  ;;  %s691_s17 = smov [#allocation7]   ;;  %s48_s16 = int_to_ptr.hbm [resolvable:$true] %s47_s16 }
   0x9   :  { %s49_s18 = sshll.u32 %s691_s17, 4  ;;  %s50_s18 = int_to_ptr.vmem [resolvable:$true] %s49_s18 }
   0xa   :  { %55 = dma.hbm_to_vmem [thread:$0]  %s48_s16, 4096, %s50_s18, [#allocation6], %s686_s9, %s686_s9, %s687_s10  }
   0xb   :  { %681 = dma.done.wait [#allocation4], 128  }
   0xc   :  { %682 = vsyncadd [#allocation4], 4294967168 }
   0xd   :  { %683 = dma.done.wait [#allocation6], 4352  }
   0xe   :  { %684 = vsyncadd [#allocation6], 4294962944  ;;  %v431_v0 = vld [vmem:[#allocation5] sm:$0xf]  ;;  %v569_v1 = vld [vmem:[#allocation5 + $0x4] sm:$0xf0] }
   0xf   :  { %v568_v2 = vld [vmem:[#allocation5 + $0x4] sm:$0xf]  ;;  %v432_v3 = vor.u32 %v569_v1, %v431_v0  ;;  %v433_v4 = vld [vmem:[#allocation5 + $0x8] sm:$0xf0]  ;;  %v567_v5 = vld [vmem:[#allocation3] sm:$0xff]  ;;  %vm100_vm0 = vcmask 130048  }
  0x10   :  { %v497_v6 = vld [vmem:[#allocation7 + $0x70] sm:$0xf]  ;;  %v436_v7 = vor.u32 %v568_v2, %v433_v4  ;;  %v585_v8 = vld [vmem:[#allocation7 + $0x74] sm:$0xf0]  ;;  %v584_v13 = vld [vmem:[#allocation7 + $0x74] sm:$0xf] }
  0x11   :  { %v561_v9 = vld [vmem:[#allocation7 + $0xf0] sm:$0xf]  ;;  %v601_v10 = vld [vmem:[#allocation7 + $0xf4] sm:$0xf0]  ;;  %111 = vmatpush.bf16.msra.mxu0 %v432_v3  ;;  %v498_v11 = vor.u32 %v585_v8, %v497_v6  ;;  %v499_v14 = vld [vmem:[#allocation7 + $0x78] sm:$0xf0] }
  0x12   :  { %v562_v12 = vor.u32 %v601_v10, %v561_v9  ;;  %v600_v15 = vld [vmem:[#allocation7 + $0xf4] sm:$0xf]  ;;  %125 = vmatpush.bf16.msra.mxu1 %v436_v7  ;;  %v502_v16 = vor.u32 %v584_v13, %v499_v14  ;;  %v563_v17 = vld [vmem:[#allocation7 + $0xf8] sm:$0xf0]  ;;  %v489_v18 = vld [vmem:[#allocation7 + $0x60] sm:$0xf] }
  0x13   :  { %v583_v19 = vld [vmem:[#allocation7 + $0x64] sm:$0xf0]  ;;  %336 = vmatpush.bf16.msra.mxu2 %v498_v11  ;;  %v566_v20 = vor.u32 %v600_v15, %v563_v17  ;;  %v553_v22 = vld [vmem:[#allocation7 + $0xe0] sm:$0xf]  ;;  %v582_v24 = vld [vmem:[#allocation7 + $0x64] sm:$0xf] }
  0x14   :  { %350 = vmatpush.bf16.msra.mxu3 %v562_v12  ;;  %v490_v21 = vor.u32 %v583_v19, %v489_v18  ;;  %v599_v23 = vld [vmem:[#allocation7 + $0xe4] sm:$0xf0]  ;;  %437 = vmatmul.msk.bf16.vlgmr.msra.gmra.mxu0 %vm100_vm0, %v567_v5  ;;  %v491_v26 = vld [vmem:[#allocation7 + $0x68] sm:$0xf0]  ;;  %v598_v27 = vld [vmem:[#allocation7 + $0xe4] sm:$0xf] }
  0x15   :  { %v554_v25 = vor.u32 %v599_v23, %v553_v22  ;;  %v555_v28 = vld [vmem:[#allocation7 + $0xe8] sm:$0xf0]  ;;  %438 = vmatmul.msk.bf16.vlgmr.msra.gmra.mxu1 %vm100_vm0, %v567_v5  ;;  %364 = vmatpush.bf16.msrb.mxu0 %v502_v16  ;;  %v494_v29 = vor.u32 %v582_v24, %v491_v26  ;;  %v481_v30 = vld [vmem:[#allocation7 + $0x50] sm:$0xf]  ;;  %v581_v31 = vld [vmem:[#allocation7 + $0x54] sm:$0xf0] }
  0x16   :  { %v545_v32 = vld [vmem:[#allocation7 + $0xd0] sm:$0xf]  ;;  %378 = vmatpush.bf16.msrb.mxu1 %v566_v20  ;;  %v558_v33 = vor.u32 %v598_v27, %v555_v28  ;;  %v597_v34 = vld [vmem:[#allocation7 + $0xd4] sm:$0xf0]  ;;  %v580_v35 = vld [vmem:[#allocation7 + $0x54] sm:$0xf]  ;;  %v482_v37 = vor.u32 %v581_v31, %v481_v30 }
  0x17   :  { %v483_v36 = vld [vmem:[#allocation7 + $0x58] sm:$0xf0]  ;;  %337 = vmatpush.bf16.msra.mxu2 %v490_v21  ;;  %v546_v38 = vor.u32 %v597_v34, %v545_v32  ;;  %v596_v39 = vld [vmem:[#allocation7 + $0xd4] sm:$0xf]  ;;  %v473_v41 = vld [vmem:[#allocation7 + $0x40] sm:$0xf] }
  0x18   :  { %351 = vmatpush.bf16.msra.mxu3 %v554_v25  ;;  %v547_v40 = vld [vmem:[#allocation7 + $0xd8] sm:$0xf0]  ;;  %v579_v42 = vld [vmem:[#allocation7 + $0x44] sm:$0xf0]  ;;  %v537_v43 = vld [vmem:[#allocation7 + $0xc0] sm:$0xf]  ;;  %v486_v45 = vor.u32 %v580_v35, %v483_v36 }
  0x19   :  { %v595_v44 = vld [vmem:[#allocation7 + $0xc4] sm:$0xf0]  ;;  %365 = vmatpush.bf16.msrb.mxu0 %v494_v29  ;;  %v550_v46 = vor.u32 %v596_v39, %v547_v40  ;;  %v578_v47 = vld [vmem:[#allocation7 + $0x44] sm:$0xf]  ;;  %v475_v48 = vld [vmem:[#allocation7 + $0x48] sm:$0xf0]  ;;  %v474_v49 = vor.u32 %v579_v42, %v473_v41 }
  0x1a   :  { %379 = vmatpush.bf16.msrb.mxu1 %v558_v33  ;;  %v538_v50 = vor.u32 %v595_v44, %v537_v43  ;;  %v594_v51 = vld [vmem:[#allocation7 + $0xc4] sm:$0xf]  ;;  %v539_v52 = vld [vmem:[#allocation7 + $0xc8] sm:$0xf0]  ;;  %v478_v53 = vor.u32 %v578_v47, %v475_v48  ;;  %v465_v55 = vld [vmem:[#allocation7 + $0x30] sm:$0xf] }
  0x1b   :  { %338 = vmatpush.bf16.msra.mxu2 %v482_v37  ;;  %v542_v54 = vor.u32 %v594_v51, %v539_v52  ;;  %v577_v56 = vld [vmem:[#allocation7 + $0x34] sm:$0xf0]  ;;  %v529_v57 = vld [vmem:[#allocation7 + $0xb0] sm:$0xf]  ;;  %v576_v60 = vld [vmem:[#allocation7 + $0x34] sm:$0xf] }
  0x1c   :  { %352 = vmatpush.bf16.msra.mxu3 %v546_v38  ;;  %v466_v58 = vor.u32 %v577_v56, %v465_v55  ;;  %v593_v59 = vld [vmem:[#allocation7 + $0xb4] sm:$0xf0]  ;;  %v467_v61 = vld [vmem:[#allocation7 + $0x38] sm:$0xf0]  ;;  %v592_v0 = vld [vmem:[#allocation7 + $0xb4] sm:$0xf] }
  0x1d   :  { %366 = vmatpush.bf16.msrb.mxu0 %v486_v45  ;;  %v530_v62 = vor.u32 %v593_v59, %v529_v57  ;;  %v470_v63 = vor.u32 %v576_v60, %v467_v61  ;;  %v531_v1 = vld [vmem:[#allocation7 + $0xb8] sm:$0xf0]  ;;  %v457_v3 = vld [vmem:[#allocation7 + $0x20] sm:$0xf]  ;;  %v575_v4 = vld [vmem:[#allocation7 + $0x24] sm:$0xf0] }
  0x1e   :  { %380 = vmatpush.bf16.msrb.mxu1 %v550_v46  ;;  %v534_v2 = vor.u32 %v592_v0, %v531_v1  ;;  %v458_v5 = vor.u32 %v575_v4, %v457_v3  ;;  %v521_v6 = vld [vmem:[#allocation7 + $0xa0] sm:$0xf]  ;;  %v591_v7 = vld [vmem:[#allocation7 + $0xa4] sm:$0xf0]  ;;  %v574_v8 = vld [vmem:[#allocation7 + $0x24] sm:$0xf] }
  0x1f   :  { %339 = vmatpush.bf16.msra.mxu2 %v474_v49  ;;  %v522_v9 = vor.u32 %v591_v7, %v521_v6  ;;  %v459_v10 = vld [vmem:[#allocation7 + $0x28] sm:$0xf0]  ;;  %v590_v11 = vld [vmem:[#allocation7 + $0xa4] sm:$0xf]  ;;  %v449_v15 = vld [vmem:[#allocation7 + $0x10] sm:$0xf] }
  0x20   :  { %353 = vmatpush.bf16.msra.mxu3 %v538_v50  ;;  %v523_v12 = vld [vmem:[#allocation7 + $0xa8] sm:$0xf0]  ;;  %v462_v13 = vor.u32 %v574_v8, %v459_v10  ;;  %v573_v16 = vld [vmem:[#allocation7 + $0x14] sm:$0xf0]  ;;  %v513_v17 = vld [vmem:[#allocation7 + $0x90] sm:$0xf] }
  0x21   :  { %367 = vmatpush.bf16.msrb.mxu0 %v478_v53  ;;  %v526_v14 = vor.u32 %v590_v11, %v523_v12  ;;  %v450_v18 = vor.u32 %v573_v16, %v449_v15  ;;  %v589_v19 = vld [vmem:[#allocation7 + $0x94] sm:$0xf0]  ;;  %v572_v20 = vld [vmem:[#allocation7 + $0x14] sm:$0xf]  ;;  %v451_v21 = vld [vmem:[#allocation7 + $0x18] sm:$0xf0] }
  0x22   :  { %381 = vmatpush.bf16.msrb.mxu1 %v542_v54  ;;  %v514_v22 = vor.u32 %v589_v19, %v513_v17  ;;  %v454_v23 = vor.u32 %v572_v20, %v451_v21  ;;  %v588_v24 = vld [vmem:[#allocation7 + $0x94] sm:$0xf]  ;;  %v515_v25 = vld [vmem:[#allocation7 + $0x98] sm:$0xf0]  ;;  %v441_v27 = vld [vmem:[#allocation7] sm:$0xf] }
  0x23   :  { %340 = vmatpush.bf16.msra.mxu2 %v466_v58  ;;  %v518_v26 = vor.u32 %v588_v24, %v515_v25  ;;  %v571_v28 = vld [vmem:[#allocation7 + $0x4] sm:$0xf0]  ;;  %v505_v29 = vld [vmem:[#allocation7 + $0x80] sm:$0xf]  ;;  %v570_v32 = vld [vmem:[#allocation7 + $0x4] sm:$0xf]  ;;  %v413_v24 = vstv %s767_s6 }
  0x24   :  { %354 = vmatpush.bf16.msra.mxu3 %v530_v62  ;;  %v442_v30 = vor.u32 %v571_v28, %v441_v27  ;;  %v587_v31 = vld [vmem:[#allocation7 + $0x84] sm:$0xf0]  ;;  %v443_v33 = vld [vmem:[#allocation7 + $0x8] sm:$0xf0]  ;;  %v586_v36 = vld [vmem:[#allocation7 + $0x84] sm:$0xf] }
  0x25   :  { %368 = vmatpush.bf16.msrb.mxu0 %v470_v63  ;;  %v506_v34 = vor.u32 %v587_v31, %v505_v29  ;;  %v446_v35 = vor.u32 %v570_v32, %v443_v33  ;;  %v507_v37 = vld [vmem:[#allocation7 + $0x88] sm:$0xf0]  ;;  %v79_v39 = vld [vmem:[%s763_s2] sm:$0x3]  ;;  %vm416_vm1 = vcmask 7168  }
  0x26   :  { %382 = vmatpush.bf16.msrb.mxu1 %v534_v2  ;;  %v510_v38 = vor.u32 %v586_v36, %v507_v37  ;;  %v81_v42 = vperm.slane %v79_v39, 0  ;;  %v82_v43 = vperm.slane %v79_v39, 1  ;;  %v170_v56 = vld [vmem:[%s765_s4] sm:$0x3] }
  0x27   :  { %341 = vmatpush.bf16.msra.mxu2 %v458_v5  ;;  %v173_v57 = vperm.slane %v170_v56, 1  ;;  %v172_v61 = vperm.slane %v170_v56, 0  ;;  %v396_v63 = vld [vmem:[%s766_s5] sm:$0x3] }
  0x28   :  { %355 = vmatpush.bf16.msra.mxu3 %v522_v9  ;;  %v399_v4 = vperm.slane %v396_v63, 1  ;;  %v398_v8 = vperm.slane %v396_v63, 0 }
  0x29   :  { %369 = vmatpush.bf16.msrb.mxu0 %v462_v13 }
  0x2a   :  { %383 = vmatpush.bf16.msrb.mxu1 %v526_v14 }
  0x2b   :  { %342 = vmatpush.bf16.msra.mxu2 %v450_v18 }
  0x2c   :  { %356 = vmatpush.bf16.msra.mxu3 %v514_v22 }
  0x2d   :  { %370 = vmatpush.bf16.msrb.mxu0 %v454_v23 }
  0x2e   :  { %384 = vmatpush.bf16.msrb.mxu1 %v518_v26 }
  0x2f   :  { %343 = vmatpush.bf16.msra.mxu2 %v442_v30 }
  0x30   :  { %357 = vmatpush.bf16.msra.mxu3 %v506_v34 }
  0x31   :  { %371 = vmatpush.bf16.msrb.mxu0 %v446_v35 }
  0x32   :  { %385 = vmatpush.bf16.msrb.mxu1 %v510_v38 }
  0x91   :  { %v113_v40 = vpop.f32.mrf.mxu0 }
  0x92   :  { %v127_v41 = vpop.f32.mrf.mxu1  ;;  %v114_v44 = vadd.f32 %v113_v40, %v81_v42 }
  0x93   :  { %v128_v45 = vadd.f32 %v127_v41, %v82_v43 }
  0x94   :  { %v132_v50 = vmax.f32 %v114_v44, 0.0 }
  0x95   :  { %v133_v52 = vmax.f32 %v128_v45, 0.0 }
  0x99   :  { %v115_v46 = vpop.f32.mrf.mxu0 }
  0x9a   :  { %v116_v47 = vadd.f32 %v115_v46, %v81_v42  ;;  %v129_v48 = vpop.f32.mrf.mxu1 }
  0x9b   :  { %v130_v49 = vadd.f32 %v129_v48, %v82_v43 }
  0x9c   :  { %v134_v51 = vmax.f32 %v116_v47, 0.0 }
  0x9d   :  { %v135_v53 = vmax.f32 %v130_v49, 0.0 }
  0x9e   :  { %v136_v54 = vpack.c.bf16 %v134_v51, %v132_v50 }
  0x9f   :  { %v137_v55 = vpack.c.bf16 %v135_v53, %v133_v52 }
  0xa0   :  { %344 = vmatmul.bf16.vlgmr.msra.gmra.mxu2 %v136_v54  ;;  %372 = vmatmul.bf16.vlgmr.msrb.gmra.mxu0 %v136_v54 }
  0xa1   :  { %358 = vmatmul.bf16.vlgmr.msra.gmra.mxu3 %v137_v55  ;;  %386 = vmatmul.bf16.vlgmr.msrb.gmra.mxu1 %v137_v55 }
 0x11d   :  { %v373_v58 = vpop.f32.mrf.mxu0 }
 0x11e   :  { %v374_v59 = vadd.f32 %v373_v58, %v173_v57  ;;  %v387_v60 = vpop.f32.mrf.mxu1 }
 0x120   :  { %v388_v62 = vadd.f32 %v387_v60, %v374_v59 }
 0x122   :  { %v393_v5 = vmax.f32 %v388_v62, 0.0 }
 0x123   :  { %v345_v0 = vpop.f32.mrf.mxu2 }
 0x124   :  { %v346_v1 = vadd.f32 %v345_v0, %v172_v61  ;;  %v359_v2 = vpop.f32.mrf.mxu3  ;;  %v403_v13 = vmul.f32 %v399_v4, %v393_v5 }
 0x125   :  { %v375_v3 = vpop.f32.mrf.mxu0 }
 0x126   :  { %v360_v6 = vadd.f32 %v359_v2, %v346_v1  ;;  %v376_v7 = vadd.f32 %v375_v3, %v173_v57  ;;  %v389_v10 = vpop.f32.mrf.mxu1 }
 0x128   :  { %v392_v9 = vmax.f32 %v360_v6, 0.0  ;;  %v390_v11 = vadd.f32 %v389_v10, %v376_v7 }
 0x12a   :  { %v402_v12 = vmul.f32 %v398_v8, %v392_v9  ;;  %v395_v18 = vmax.f32 %v390_v11, 0.0 }
 0x12b   :  { %v347_v14 = vpop.f32.mrf.mxu2 }
 0x12c   :  { %v348_v15 = vadd.f32 %v347_v14, %v172_v61  ;;  %v406_v16 = vadd.f32 %v403_v13, %v402_v12  ;;  %v361_v17 = vpop.f32.mrf.mxu3  ;;  %v405_v21 = vmul.f32 %v399_v4, %v395_v18 }
 0x12e   :  { %v362_v19 = vadd.f32 %v361_v17, %v348_v15  ;;  %407 = vadd.xlane.f32.xlu0 %v406_v16 }
 0x130   :  { %v394_v20 = vmax.f32 %v362_v19, 0.0 }
 0x132   :  { %v404_v22 = vmul.f32 %v398_v8, %v394_v20 }
 0x134   :  { %v409_v23 = vadd.f32 %v405_v21, %v404_v22 }
 0x136   :  { %410 = vadd.xlane.f32.xlu0 %v409_v23 }
 0x1a1   :  { %v408_v25 = vpop.xlane.xlu0 %407 }
 0x1a2   :  { %v414_v26 = vadd.f32 %v413_v24, %v408_v25 }
 0x1a4   :  { %417 = vst.msk [vmem:[%s768_s7] sm:$0xff] %vm416_vm1, %v414_v26 }
 0x1a9   :  { %v411_v27 = vpop.xlane.xlu0 %410 }
 0x1aa   :  { %v415_v28 = vadd.f32 %v413_v24, %v411_v27 }
 0x1ac   :  { %418 = vst.msk [vmem:[%s768_s7 + $0x8] sm:$0xff] %vm416_vm1, %v415_v28 }
 0x1ad   :  { %423 = vsyncpa [#allocation4], 1 }
 0x1ae   :  { %424 = vsyncpa [#allocation6], 1 }

</bundles_post_ra>
